<compile_context>
chip_gen: v5e
topology: v5e:2x2
jax: 0.10.0
libtpu: 0.0.40
codegen_flags: <defaults>
</compile_context>

<pallas_src>
import functools

import jax
import jax.numpy as jnp
from jax.experimental import pallas as pl
from jax.experimental.pallas import tpu as pltpu


_VMEM_INPUT_BUDGET = 24 * 1024 * 1024   # double-buffered input blocks (v7x-safe)


# ---------------------------------------------------------------------------
# Kernel helpers
# ---------------------------------------------------------------------------
def _accumulate(pred_ref, gt_ref, out_ref, widths, *, acc_w, rows, B, C,
                is_onehot, gt_values):
    """Accumulate lane-wide partial sums for the chunks listed in `widths`.

    pred_ref : (rows=B*C, tile) native-dtype prediction tile
    gt_ref   : (rows, tile) one-hot gt  OR  (B, tile) label map
    out_ref  : (1, 3, rows, acc_w) resident partial sums
               (0 = intersection, 1 = sum(pred^2), 2 = sum(gt^2))
    widths   : static tuple of chunk widths (all == acc_w except possibly the
               last, which handles the ragged tail with static shapes - no
               runtime masking needed).
    """
    inter = jnp.zeros((rows, acc_w), jnp.float32)
    psq = jnp.zeros((rows, acc_w), jnp.float32)
    gsq = jnp.zeros((rows, acc_w), jnp.float32)

    def pad_lanes(x):
        w = x.shape[1]
        if w == acc_w:
            return x
        return jnp.concatenate(
            [x, jnp.zeros((x.shape[0], acc_w - w), x.dtype)], axis=1)

    off = 0
    for w in widths:
        sl = slice(off, off + w)
        pred_c = pad_lanes(pred_ref[:, sl].astype(jnp.float32))   # (rows, acc_w)

        if is_onehot:
            gt_c = pad_lanes(gt_ref[:, sl].astype(jnp.float32))
            inter = inter + pred_c * gt_c
            gsq = gsq + gt_c * gt_c          # matches torch gt**2 (soft labels)
        else:
            # On-the-fly one-hot: row b*C + c  <-  (gt[b] == gt_values[c]).
            # Class values are static Python scalars -> no captured constants,
            # and only B*C (not B^2*C) compares per chunk.
            g = gt_ref[:, sl].astype(jnp.float32)                 # (B, w)
            oh_rows = []
            for b in range(B):
                gb = g[b:b + 1]                                   # (1, w)
                for c in range(C):
                    oh_rows.append((gb == float(gt_values[c])).astype(jnp.float32))
            oh = pad_lanes(jnp.concatenate(oh_rows, axis=0))      # (rows, acc_w)
            inter = inter + oh * pred_c
            gsq = gsq + oh                                        # onehot^2 == onehot

        psq = psq + pred_c * pred_c
        off += w

    out_ref[0, 0, :, :] += inter
    out_ref[0, 1, :, :] += psq
    out_ref[0, 2, :, :] += gsq


def _dice_kernel(pred_ref, gt_ref, out_ref, *, rows, B, C, acc_w,
                 full_widths, last_widths, tiles_per_core, num_tiles,
                 is_onehot, gt_values):
    s = pl.program_id(1)

    @pl.when(s == 0)
    def _init():
        out_ref[...] = jnp.zeros_like(out_ref)

    kwargs = dict(acc_w=acc_w, rows=rows, B=B, C=C,
                  is_onehot=is_onehot, gt_values=gt_values)

    if last_widths == full_widths:
        # Every grid step sees a full, fully-valid tile (or there is only one).
        _accumulate(pred_ref, gt_ref, out_ref, full_widths, **kwargs)
    else:
        # Only the final tile is ragged; every other step runs the unmasked
        # fast path (tail handling hoisted out of the hot loop, all static).
        p = pl.program_id(0)
        is_last = (p * tiles_per_core + s) == (num_tiles - 1)

        @pl.when(jnp.logical_not(is_last))
        def _full():
            _accumulate(pred_ref, gt_ref, out_ref, full_widths, **kwargs)

        @pl.when(is_last)
        def _ragged():
            _accumulate(pred_ref, gt_ref, out_ref, last_widths, **kwargs)


# ---------------------------------------------------------------------------
# Tiling plan + wrapper
# ---------------------------------------------------------------------------
def _chunk_widths(extent, acc_w):
    n_full, rem = divmod(extent, acc_w)
    return tuple([acc_w] * n_full + ([rem] if rem else []))


def _auto_n_parallel():
    # 2 TensorCores per chip only on v7x-class devices; v5e/v6e are single-TC.
    try:
        kind = jax.devices()[0].device_kind.lower()
    except Exception:
        return 1
    return 2 if "v7" in kind else 1


def _plan_tiling(S, *, rows, gt_rows, pred_bytes, gt_bytes, acc_width,
                 n_parallel, target_step_bytes, max_chunks):
    # Accumulator width: three (rows, acc_w) f32 accumulators must stay well
    # under the vreg budget -> keep rows*acc_w <= ~4096 (<=12 vregs total).
    cap = max(128, ((4096 // max(rows, 1)) // 128) * 128)
    acc_w = max(128, (min(acc_width, cap) // 128) * 128)

    # Per-grid-step bytes: big enough to amortize the ~0.35us step overhead,
    # capped by the (double-buffered) VMEM input budget and by max_chunks
    # (bounds the statically-unrolled chunk loop).
    lane_bytes = rows * pred_bytes + gt_rows * gt_bytes
    chunk_bytes = max(1, lane_bytes * acc_w)
    by_target = max(1, target_step_bytes // chunk_bytes)
    by_vmem = max(1, _VMEM_INPUT_BUDGET // (2 * chunk_bytes))
    chunks = int(min(max_chunks, by_target, by_vmem))
    tile = chunks * acc_w

    if tile >= S:
        tile = S                      # block equals full dim -> always legal
        num_tiles = 1
        full_w = last_w = _chunk_widths(S, acc_w)
    else:
        num_tiles = pl.cdiv(S, tile)  # tile is a multiple of 128 here
        full_w = _chunk_widths(tile, acc_w)
        last_w = _chunk_widths(S - (num_tiles - 1) * tile, acc_w)

    n_par = max(1, int(n_parallel))
    if num_tiles % n_par != 0:
        n_par = 1                     # keep the grid rectangular, never shrink tile
    tiles_per_core = num_tiles // n_par
    return tile, acc_w, num_tiles, n_par, tiles_per_core, full_w, last_w


def dice_loss(prediction, ground_truth, *, num_classes, eps=1e-6,
              isOneHot=False, gt_values=None, acc_width=512, n_parallel=None,
              target_step_bytes=2 * 1024 * 1024, max_chunks=64):
    """Dice loss over (B, C, D, H, W) predictions.

    Inputs stream in their native dtypes (cast in-kernel). For a bandwidth-
    bound kernel, pass labels as int8/uint8 and one-hot gt as bf16 to cut HBM
    traffic; f32/int32 also work.
    """
    assert prediction.ndim == 5, "prediction must be (B, C, D, H, W)"
    B, C, D, H, W = prediction.shape
    assert C == num_classes
    S = D * H * W
    rows = B * C

    # Flatten to (B*C, S): rows fill the sublane axis, S maps to lanes.
    pred = prediction.reshape(rows, S)

    if isOneHot:
        gt = ground_truth.reshape(rows, S)
        gt_rows = rows
    else:
        if gt_values is None:
            raise ValueError(
                "gt_values must be provided if ground truth is not one-hot encoded.")
        gt = ground_truth
        if gt.ndim == 5 and gt.shape[1] == 1:        # mirrors torch squeeze(1)
            gt = gt.reshape(B, D, H, W)
        gt = gt.reshape(B, S)
        gt_rows = B

    if n_parallel is None:
        n_parallel = _auto_n_parallel()

    (tile, acc_w, num_tiles, n_par, tpc, full_w, last_w) = _plan_tiling(
        S, rows=rows, gt_rows=gt_rows,
        pred_bytes=pred.dtype.itemsize, gt_bytes=gt.dtype.itemsize,
        acc_width=acc_width, n_parallel=n_parallel,
        target_step_bytes=target_step_bytes, max_chunks=max_chunks)

    in_idx = lambda p, s: (0, p * tpc + s)
    kernel = functools.partial(
        _dice_kernel, rows=rows, B=B, C=C, acc_w=acc_w,
        full_widths=full_w, last_widths=last_w, tiles_per_core=tpc,
        num_tiles=num_tiles, is_onehot=isOneHot,
        gt_values=None if isOneHot else tuple(gt_values))

    partials = pl.pallas_call(
        kernel,
        out_shape=jax.ShapeDtypeStruct((n_par, 3, rows, acc_w), jnp.float32),
        grid_spec=pltpu.PrefetchScalarGridSpec(
            num_scalar_prefetch=0,
            grid=(n_par, tpc),
            in_specs=[
                pl.BlockSpec((rows, tile), in_idx),
                pl.BlockSpec((gt_rows, tile), in_idx),
            ],
            out_specs=pl.BlockSpec((1, 3, rows, acc_w),
                                   lambda p, s: (p, 0, 0, 0)),
        ),
        compiler_params=pltpu.CompilerParams(
            dimension_semantics=("parallel", "arbitrary"),
            vmem_limit_bytes=32 * 1024 * 1024),
    )(pred, gt)

    # Tiny plain-JAX epilogue: cross-lane / cross-core sum + dice formula.
    sums = jnp.sum(partials, axis=(0, 3))            # (3, B*C)
    inter = sums[0].reshape(B, C)
    psq = sums[1].reshape(B, C)
    gsq = sums[2].reshape(B, C)
    dice = (2.0 * inter + eps) / (psq + gsq + eps)   # (B, C)
    # mean over batch then channels == overall mean (equal counts)
    return 1.0 - jnp.mean(dice)


# ---------------------------------------------------------------------------
# Pure-JAX reference (mirrors the PyTorch forward exactly)
# ---------------------------------------------------------------------------
def _one_hot_encoding_ref(gt, gt_values, num_classes):
    if gt.ndim == 5 and gt.shape[1] == 1:
        gt = jnp.squeeze(gt, axis=1)
    chans = [(gt == gt_values[idx]).astype(jnp.float32)
             for idx in range(num_classes)]
    return jnp.stack(chans, axis=1)


def _dice_loss_ref(prediction, ground_truth, *, num_classes, eps=1e-6,
                   isOneHot=False, gt_values=None):
    if not isOneHot:
        ground_truth = _one_hot_encoding_ref(ground_truth, gt_values, num_classes)
    prediction = prediction.astype(jnp.float32)
    ground_truth = ground_truth.astype(jnp.float32)
    intersection = jnp.sum(prediction * ground_truth, axis=(2, 3, 4))
    union = jnp.sum(prediction ** 2, axis=(2, 3, 4)) + \
        jnp.sum(ground_truth ** 2, axis=(2, 3, 4))
    dice_score_channel = (2 * intersection + eps) / (union + eps)
    dice_score_channel = jnp.mean(dice_score_channel, axis=0)
    return 1.0 - jnp.mean(dice_score_channel)


# ---------------------------------------------------------------------------
# Demo
# ---------------------------------------------------------------------------
if __name__ == "__main__":
    # S = 3168 is NOT a multiple of 512 -> exercises the ragged final tile
    # (static remainder chunk), the multi-tile grid, and the parallel axis.
    B, C, D, H, W = 2, 4, 4, 8, 99
    eps = 1e-6
    gt_values = (0, 1, 2, 3)

    key = jax.random.PRNGKey(0)
    kp, kg = jax.random.split(key)
    prediction = jax.nn.softmax(
        jax.random.normal(kp, (B, C, D, H, W), jnp.float32), axis=1)
    labels = jax.random.randint(kg, (B, 1, D, H, W), 0, C, dtype=jnp.int32)

    ref_labels = _dice_loss_ref(prediction, labels, num_classes=C, eps=eps,
                                isOneHot=False, gt_values=gt_values)

    # 1) label (non-one-hot) path, multi-tile grid (small per-step byte target
    #    forces several grid steps + ragged last tile).
    loss1 = dice_loss(prediction, labels, num_classes=C, eps=eps,
                      isOneHot=False, gt_values=gt_values,
                      target_step_bytes=64 * 1024)
    loss1 = jax.block_until_ready(loss1)
    assert jnp.allclose(loss1, ref_labels, atol=1e-5, rtol=1e-5), (loss1, ref_labels)

    # 2) label path with a 2-way parallel grid axis (as used on dual-TC chips).
    loss2 = dice_loss(prediction, labels, num_classes=C, eps=eps,
                      isOneHot=False, gt_values=gt_values,
                      max_chunks=2, n_parallel=2)
    loss2 = jax.block_until_ready(loss2)
    assert jnp.allclose(loss2, ref_labels, atol=1e-5, rtol=1e-5), (loss2, ref_labels)

    # 3) already-one-hot path, default plan (single large tile).
    gt_onehot = _one_hot_encoding_ref(labels, gt_values, C)
    loss3 = dice_loss(prediction, gt_onehot, num_classes=C, eps=eps, isOneHot=True)
    loss3 = jax.block_until_ready(loss3)
    ref_onehot = _dice_loss_ref(prediction, gt_onehot, num_classes=C, eps=eps,
                                isOneHot=True)
    assert jnp.allclose(loss3, ref_onehot, atol=1e-5, rtol=1e-5), (loss3, ref_onehot)

    print("KERNEL_OK")
</pallas_src>

<mosaic_0001>
module attributes {stable_mosaic.version = 11 : i64} {
  func.func @_dice_kernel(%arg0: i32, %arg1: i32, %arg2: memref<8x1536xf32, #tpu.memory_space<vmem>>, %arg3: memref<2x1536xi32, #tpu.memory_space<vmem>>, %arg4: memref<1x3x8x512xf32, #tpu.memory_space<vmem>>) attributes {dimension_semantics = [#tpu.dimension_semantics<parallel>, #tpu.dimension_semantics<arbitrary>], iteration_bounds = array<i64: 1, 3>, scalar_prefetch = 0 : i64, scratch_operands = 0 : i64, tpu.core_type = #tpu.core_type<tc>, window_params = [{transform_indices = @transform_0, window_bounds = array<i64: 8, 1536>}, {transform_indices = @transform_1, window_bounds = array<i64: 2, 1536>}, {transform_indices = @transform_2, window_bounds = array<i64: 1, 3, 8, 512>}]} {
    %c0_i32 = arith.constant 0 : i32
    %0 = arith.cmpi eq, %arg1, %c0_i32 : i32
    %1 = arith.extui %0 : i1 to i32
    %c0_i32_0 = arith.constant 0 : i32
    %2 = arith.cmpi ne, %1, %c0_i32_0 : i32
    scf.if %2 {
      %cst = arith.constant 0.000000e+00 : f32
      %11 = vector.broadcast %cst : f32 to vector<1x3x8x512xf32>
      %c0 = arith.constant 0 : index
      %c0_3 = arith.constant 0 : index
      %c0_4 = arith.constant 0 : index
      %c0_5 = arith.constant 0 : index
      %12 = vector.load %arg4[%c0, %c0_3, %c0_4, %c0_5] : memref<1x3x8x512xf32, #tpu.memory_space<vmem>>, vector<1x3x8x512xf32>
      tpu.vector_store %arg4[%c0, %c0_3, %c0_4, %c0_5], %11 {strides = array<i32>} : memref<1x3x8x512xf32, #tpu.memory_space<vmem>>, vector<1x3x8x512xf32>,
    } else {
    }
    %c3_i32 = arith.constant 3 : i32
    %3 = arith.muli %arg0, %c3_i32 : i32
    %4 = arith.addi %3, %arg1 : i32
    %c2_i32 = arith.constant 2 : i32
    %5 = arith.cmpi eq, %4, %c2_i32 : i32
    %true = arith.constant true
    %6 = arith.xori %5, %true : i1
    %7 = arith.extui %6 : i1 to i32
    %c0_i32_1 = arith.constant 0 : i32
    %8 = arith.cmpi ne, %7, %c0_i32_1 : i32
    scf.if %8 {
      %cst = arith.constant 0.000000e+00 : f32
      %11 = vector.broadcast %cst : f32 to vector<8x512xf32>
      %cst_3 = arith.constant 0.000000e+00 : f32
      %12 = vector.broadcast %cst_3 : f32 to vector<8x512xf32>
      %cst_4 = arith.constant 0.000000e+00 : f32
      %13 = vector.broadcast %cst_4 : f32 to vector<8x512xf32>
      %c0 = arith.constant 0 : index
      %c0_5 = arith.constant 0 : index
      %14 = vector.load %arg2[%c0, %c0_5] : memref<8x1536xf32, #tpu.memory_space<vmem>>, vector<8x512xf32>
      %c0_6 = arith.constant 0 : index
      %c0_7 = arith.constant 0 : index
      %15 = vector.load %arg3[%c0_6, %c0_7] : memref<2x1536xi32, #tpu.memory_space<vmem>>, vector<2x512xi32>
      %16 = arith.sitofp %15 : vector<2x512xi32> to vector<2x512xf32>
      %17 = vector.extract_strided_slice %16 {offsets = [0, 0], sizes = [1, 512], strides = [1, 1]} : vector<2x512xf32> to vector<1x512xf32>
      %cst_8 = arith.constant 0.000000e+00 : f32
      %18 = vector.broadcast %cst_8 : f32 to vector<1x512xf32>
      %19 = arith.cmpf oeq, %17, %18 : vector<1x512xf32>
      %20 = arith.extui %19 : vector<1x512xi1> to vector<1x512xi32>
      %21 = arith.sitofp %20 : vector<1x512xi32> to vector<1x512xf32>
      %cst_9 = arith.constant 1.000000e+00 : f32
      %22 = vector.broadcast %cst_9 : f32 to vector<1x512xf32>
      %23 = arith.cmpf oeq, %17, %22 : vector<1x512xf32>
      %24 = arith.extui %23 : vector<1x512xi1> to vector<1x512xi32>
      %25 = arith.sitofp %24 : vector<1x512xi32> to vector<1x512xf32>
      %cst_10 = arith.constant 2.000000e+00 : f32
      %26 = vector.broadcast %cst_10 : f32 to vector<1x512xf32>
      %27 = arith.cmpf oeq, %17, %26 : vector<1x512xf32>
      %28 = arith.extui %27 : vector<1x512xi1> to vector<1x512xi32>
      %29 = arith.sitofp %28 : vector<1x512xi32> to vector<1x512xf32>
      %cst_11 = arith.constant 3.000000e+00 : f32
      %30 = vector.broadcast %cst_11 : f32 to vector<1x512xf32>
      %31 = arith.cmpf oeq, %17, %30 : vector<1x512xf32>
      %32 = arith.extui %31 : vector<1x512xi1> to vector<1x512xi32>
      %33 = arith.sitofp %32 : vector<1x512xi32> to vector<1x512xf32>
      %34 = vector.extract_strided_slice %16 {offsets = [1, 0], sizes = [1, 512], strides = [1, 1]} : vector<2x512xf32> to vector<1x512xf32>
      %cst_12 = arith.constant 0.000000e+00 : f32
      %35 = vector.broadcast %cst_12 : f32 to vector<1x512xf32>
      %36 = arith.cmpf oeq, %34, %35 : vector<1x512xf32>
      %37 = arith.extui %36 : vector<1x512xi1> to vector<1x512xi32>
      %38 = arith.sitofp %37 : vector<1x512xi32> to vector<1x512xf32>
      %cst_13 = arith.constant 1.000000e+00 : f32
      %39 = vector.broadcast %cst_13 : f32 to vector<1x512xf32>
      %40 = arith.cmpf oeq, %34, %39 : vector<1x512xf32>
      %41 = arith.extui %40 : vector<1x512xi1> to vector<1x512xi32>
      %42 = arith.sitofp %41 : vector<1x512xi32> to vector<1x512xf32>
      %cst_14 = arith.constant 2.000000e+00 : f32
      %43 = vector.broadcast %cst_14 : f32 to vector<1x512xf32>
      %44 = arith.cmpf oeq, %34, %43 : vector<1x512xf32>
      %45 = arith.extui %44 : vector<1x512xi1> to vector<1x512xi32>
      %46 = arith.sitofp %45 : vector<1x512xi32> to vector<1x512xf32>
      %cst_15 = arith.constant 3.000000e+00 : f32
      %47 = vector.broadcast %cst_15 : f32 to vector<1x512xf32>
      %48 = arith.cmpf oeq, %34, %47 : vector<1x512xf32>
      %49 = arith.extui %48 : vector<1x512xi1> to vector<1x512xi32>
      %50 = arith.sitofp %49 : vector<1x512xi32> to vector<1x512xf32>
      %51 = tpu.concatenate %21, %25, %29, %33, %38, %42, %46, %50 in 0 : vector<1x512xf32>, vector<1x512xf32>, vector<1x512xf32>, vector<1x512xf32>, vector<1x512xf32>, vector<1x512xf32>, vector<1x512xf32>, vector<1x512xf32> -> vector<8x512xf32>
      %52 = arith.mulf %51, %14 : vector<8x512xf32>
      %53 = arith.addf %11, %52 : vector<8x512xf32>
      %54 = arith.addf %13, %51 : vector<8x512xf32>
      %55 = arith.mulf %14, %14 : vector<8x512xf32>
      %56 = arith.addf %12, %55 : vector<8x512xf32>
      %c0_16 = arith.constant 0 : index
      %c512 = arith.constant 512 : index
      %57 = vector.load %arg2[%c0_16, %c512] : memref<8x1536xf32, #tpu.memory_space<vmem>>, vector<8x512xf32>
      %c0_17 = arith.constant 0 : index
      %c512_18 = arith.constant 512 : index
      %58 = vector.load %arg3[%c0_17, %c512_18] : memref<2x1536xi32, #tpu.memory_space<vmem>>, vector<2x512xi32>
      %59 = arith.sitofp %58 : vector<2x512xi32> to vector<2x512xf32>
      %60 = vector.extract_strided_slice %59 {offsets = [0, 0], sizes = [1, 512], strides = [1, 1]} : vector<2x512xf32> to vector<1x512xf32>
      %cst_19 = arith.constant 0.000000e+00 : f32
      %61 = vector.broadcast %cst_19 : f32 to vector<1x512xf32>
      %62 = arith.cmpf oeq, %60, %61 : vector<1x512xf32>
      %63 = arith.extui %62 : vector<1x512xi1> to vector<1x512xi32>
      %64 = arith.sitofp %63 : vector<1x512xi32> to vector<1x512xf32>
      %cst_20 = arith.constant 1.000000e+00 : f32
      %65 = vector.broadcast %cst_20 : f32 to vector<1x512xf32>
      %66 = arith.cmpf oeq, %60, %65 : vector<1x512xf32>
      %67 = arith.extui %66 : vector<1x512xi1> to vector<1x512xi32>
      %68 = arith.sitofp %67 : vector<1x512xi32> to vector<1x512xf32>
      %cst_21 = arith.constant 2.000000e+00 : f32
      %69 = vector.broadcast %cst_21 : f32 to vector<1x512xf32>
      %70 = arith.cmpf oeq, %60, %69 : vector<1x512xf32>
      %71 = arith.extui %70 : vector<1x512xi1> to vector<1x512xi32>
      %72 = arith.sitofp %71 : vector<1x512xi32> to vector<1x512xf32>
      %cst_22 = arith.constant 3.000000e+00 : f32
      %73 = vector.broadcast %cst_22 : f32 to vector<1x512xf32>
      %74 = arith.cmpf oeq, %60, %73 : vector<1x512xf32>
      %75 = arith.extui %74 : vector<1x512xi1> to vector<1x512xi32>
      %76 = arith.sitofp %75 : vector<1x512xi32> to vector<1x512xf32>
      %77 = vector.extract_strided_slice %59 {offsets = [1, 0], sizes = [1, 512], strides = [1, 1]} : vector<2x512xf32> to vector<1x512xf32>
      %cst_23 = arith.constant 0.000000e+00 : f32
      %78 = vector.broadcast %cst_23 : f32 to vector<1x512xf32>
      %79 = arith.cmpf oeq, %77, %78 : vector<1x512xf32>
      %80 = arith.extui %79 : vector<1x512xi1> to vector<1x512xi32>
      %81 = arith.sitofp %80 : vector<1x512xi32> to vector<1x512xf32>
      %cst_24 = arith.constant 1.000000e+00 : f32
      %82 = vector.broadcast %cst_24 : f32 to vector<1x512xf32>
      %83 = arith.cmpf oeq, %77, %82 : vector<1x512xf32>
      %84 = arith.extui %83 : vector<1x512xi1> to vector<1x512xi32>
      %85 = arith.sitofp %84 : vector<1x512xi32> to vector<1x512xf32>
      %cst_25 = arith.constant 2.000000e+00 : f32
      %86 = vector.broadcast %cst_25 : f32 to vector<1x512xf32>
      %87 = arith.cmpf oeq, %77, %86 : vector<1x512xf32>
      %88 = arith.extui %87 : vector<1x512xi1> to vector<1x512xi32>
      %89 = arith.sitofp %88 : vector<1x512xi32> to vector<1x512xf32>
      %cst_26 = arith.constant 3.000000e+00 : f32
      %90 = vector.broadcast %cst_26 : f32 to vector<1x512xf32>
      %91 = arith.cmpf oeq, %77, %90 : vector<1x512xf32>
      %92 = arith.extui %91 : vector<1x512xi1> to vector<1x512xi32>
      %93 = arith.sitofp %92 : vector<1x512xi32> to vector<1x512xf32>
      %94 = tpu.concatenate %64, %68, %72, %76, %81, %85, %89, %93 in 0 : vector<1x512xf32>, vector<1x512xf32>, vector<1x512xf32>, vector<1x512xf32>, vector<1x512xf32>, vector<1x512xf32>, vector<1x512xf32>, vector<1x512xf32> -> vector<8x512xf32>
      %95 = arith.mulf %94, %57 : vector<8x512xf32>
      %96 = arith.addf %53, %95 : vector<8x512xf32>
      %97 = arith.addf %54, %94 : vector<8x512xf32>
      %98 = arith.mulf %57, %57 : vector<8x512xf32>
      %99 = arith.addf %56, %98 : vector<8x512xf32>
      %c0_27 = arith.constant 0 : index
      %c1024 = arith.constant 1024 : index
      %100 = vector.load %arg2[%c0_27, %c1024] : memref<8x1536xf32, #tpu.memory_space<vmem>>, vector<8x512xf32>
      %c0_28 = arith.constant 0 : index
      %c1024_29 = arith.constant 1024 : index
      %101 = vector.load %arg3[%c0_28, %c1024_29] : memref<2x1536xi32, #tpu.memory_space<vmem>>, vector<2x512xi32>
      %102 = arith.sitofp %101 : vector<2x512xi32> to vector<2x512xf32>
      %103 = vector.extract_strided_slice %102 {offsets = [0, 0], sizes = [1, 512], strides = [1, 1]} : vector<2x512xf32> to vector<1x512xf32>
      %cst_30 = arith.constant 0.000000e+00 : f32
      %104 = vector.broadcast %cst_30 : f32 to vector<1x512xf32>
      %105 = arith.cmpf oeq, %103, %104 : vector<1x512xf32>
      %106 = arith.extui %105 : vector<1x512xi1> to vector<1x512xi32>
      %107 = arith.sitofp %106 : vector<1x512xi32> to vector<1x512xf32>
      %cst_31 = arith.constant 1.000000e+00 : f32
      %108 = vector.broadcast %cst_31 : f32 to vector<1x512xf32>
      %109 = arith.cmpf oeq, %103, %108 : vector<1x512xf32>
      %110 = arith.extui %109 : vector<1x512xi1> to vector<1x512xi32>
      %111 = arith.sitofp %110 : vector<1x512xi32> to vector<1x512xf32>
      %cst_32 = arith.constant 2.000000e+00 : f32
      %112 = vector.broadcast %cst_32 : f32 to vector<1x512xf32>
      %113 = arith.cmpf oeq, %103, %112 : vector<1x512xf32>
      %114 = arith.extui %113 : vector<1x512xi1> to vector<1x512xi32>
      %115 = arith.sitofp %114 : vector<1x512xi32> to vector<1x512xf32>
      %cst_33 = arith.constant 3.000000e+00 : f32
      %116 = vector.broadcast %cst_33 : f32 to vector<1x512xf32>
      %117 = arith.cmpf oeq, %103, %116 : vector<1x512xf32>
      %118 = arith.extui %117 : vector<1x512xi1> to vector<1x512xi32>
      %119 = arith.sitofp %118 : vector<1x512xi32> to vector<1x512xf32>
      %120 = vector.extract_strided_slice %102 {offsets = [1, 0], sizes = [1, 512], strides = [1, 1]} : vector<2x512xf32> to vector<1x512xf32>
      %cst_34 = arith.constant 0.000000e+00 : f32
      %121 = vector.broadcast %cst_34 : f32 to vector<1x512xf32>
      %122 = arith.cmpf oeq, %120, %121 : vector<1x512xf32>
      %123 = arith.extui %122 : vector<1x512xi1> to vector<1x512xi32>
      %124 = arith.sitofp %123 : vector<1x512xi32> to vector<1x512xf32>
      %cst_35 = arith.constant 1.000000e+00 : f32
      %125 = vector.broadcast %cst_35 : f32 to vector<1x512xf32>
      %126 = arith.cmpf oeq, %120, %125 : vector<1x512xf32>
      %127 = arith.extui %126 : vector<1x512xi1> to vector<1x512xi32>
      %128 = arith.sitofp %127 : vector<1x512xi32> to vector<1x512xf32>
      %cst_36 = arith.constant 2.000000e+00 : f32
      %129 = vector.broadcast %cst_36 : f32 to vector<1x512xf32>
      %130 = arith.cmpf oeq, %120, %129 : vector<1x512xf32>
      %131 = arith.extui %130 : vector<1x512xi1> to vector<1x512xi32>
      %132 = arith.sitofp %131 : vector<1x512xi32> to vector<1x512xf32>
      %cst_37 = arith.constant 3.000000e+00 : f32
      %133 = vector.broadcast %cst_37 : f32 to vector<1x512xf32>
      %134 = arith.cmpf oeq, %120, %133 : vector<1x512xf32>
      %135 = arith.extui %134 : vector<1x512xi1> to vector<1x512xi32>
      %136 = arith.sitofp %135 : vector<1x512xi32> to vector<1x512xf32>
      %137 = tpu.concatenate %107, %111, %115, %119, %124, %128, %132, %136 in 0 : vector<1x512xf32>, vector<1x512xf32>, vector<1x512xf32>, vector<1x512xf32>, vector<1x512xf32>, vector<1x512xf32>, vector<1x512xf32>, vector<1x512xf32> -> vector<8x512xf32>
      %138 = arith.mulf %137, %100 : vector<8x512xf32>
      %139 = arith.addf %96, %138 : vector<8x512xf32>
      %140 = arith.addf %97, %137 : vector<8x512xf32>
      %141 = arith.mulf %100, %100 : vector<8x512xf32>
      %142 = arith.addf %99, %141 : vector<8x512xf32>
      %c0_38 = arith.constant 0 : index
      %c0_39 = arith.constant 0 : index
      %c0_40 = arith.constant 0 : index
      %c0_41 = arith.constant 0 : index
      %143 = vector.load %arg4[%c0_38, %c0_39, %c0_40, %c0_41] : memref<1x3x8x512xf32, #tpu.memory_space<vmem>>, vector<1x1x8x512xf32>
      %144 = vector.shape_cast %143 : vector<1x1x8x512xf32> to vector<8x512xf32>
      %145 = arith.addf %144, %139 : vector<8x512xf32>
      %c0_42 = arith.constant 0 : index
      %c0_43 = arith.constant 0 : index
      %c0_44 = arith.constant 0 : index
      %c0_45 = arith.constant 0 : index
      %146 = vector.load %arg4[%c0_42, %c0_43, %c0_44, %c0_45] : memref<1x3x8x512xf32, #tpu.memory_space<vmem>>, vector<1x1x8x512xf32>
      %147 = vector.shape_cast %146 : vector<1x1x8x512xf32> to vector<8x512xf32>
      %148 = vector.shape_cast %145 : vector<8x512xf32> to vector<1x1x8x512xf32>
      tpu.vector_store %arg4[%c0_42, %c0_43, %c0_44, %c0_45], %148 {strides = array<i32>} : memref<1x3x8x512xf32, #tpu.memory_space<vmem>>, vector<1x1x8x512xf32>,
      %c0_46 = arith.constant 0 : index
      %c1 = arith.constant 1 : index
      %c0_47 = arith.constant 0 : index
      %c0_48 = arith.constant 0 : index
      %149 = vector.load %arg4[%c0_46, %c1, %c0_47, %c0_48] : memref<1x3x8x512xf32, #tpu.memory_space<vmem>>, vector<1x1x8x512xf32>
      %150 = vector.shape_cast %149 : vector<1x1x8x512xf32> to vector<8x512xf32>
      %151 = arith.addf %150, %142 : vector<8x512xf32>
      %c0_49 = arith.constant 0 : index
      %c1_50 = arith.constant 1 : index
      %c0_51 = arith.constant 0 : index
      %c0_52 = arith.constant 0 : index
      %152 = vector.load %arg4[%c0_49, %c1_50, %c0_51, %c0_52] : memref<1x3x8x512xf32, #tpu.memory_space<vmem>>, vector<1x1x8x512xf32>
      %153 = vector.shape_cast %152 : vector<1x1x8x512xf32> to vector<8x512xf32>
      %154 = vector.shape_cast %151 : vector<8x512xf32> to vector<1x1x8x512xf32>
      tpu.vector_store %arg4[%c0_49, %c1_50, %c0_51, %c0_52], %154 {strides = array<i32>} : memref<1x3x8x512xf32, #tpu.memory_space<vmem>>, vector<1x1x8x512xf32>,
      %c0_53 = arith.constant 0 : index
      %c2 = arith.constant 2 : index
      %c0_54 = arith.constant 0 : index
      %c0_55 = arith.constant 0 : index
      %155 = vector.load %arg4[%c0_53, %c2, %c0_54, %c0_55] : memref<1x3x8x512xf32, #tpu.memory_space<vmem>>, vector<1x1x8x512xf32>
      %156 = vector.shape_cast %155 : vector<1x1x8x512xf32> to vector<8x512xf32>
      %157 = arith.addf %156, %140 : vector<8x512xf32>
      %c0_56 = arith.constant 0 : index
      %c2_57 = arith.constant 2 : index
      %c0_58 = arith.constant 0 : index
      %c0_59 = arith.constant 0 : index
      %158 = vector.load %arg4[%c0_56, %c2_57, %c0_58, %c0_59] : memref<1x3x8x512xf32, #tpu.memory_space<vmem>>, vector<1x1x8x512xf32>
      %159 = vector.shape_cast %158 : vector<1x1x8x512xf32> to vector<8x512xf32>
      %160 = vector.shape_cast %157 : vector<8x512xf32> to vector<1x1x8x512xf32>
      tpu.vector_store %arg4[%c0_56, %c2_57, %c0_58, %c0_59], %160 {strides = array<i32>} : memref<1x3x8x512xf32, #tpu.memory_space<vmem>>, vector<1x1x8x512xf32>,
    } else {
    }
    %9 = arith.extui %5 : i1 to i32
    %c0_i32_2 = arith.constant 0 : i32
    %10 = arith.cmpi ne, %9, %c0_i32_2 : i32
    scf.if %10 {
      %cst = arith.constant 0.000000e+00 : f32
      %11 = vector.broadcast %cst : f32 to vector<8x512xf32>
      %cst_3 = arith.constant 0.000000e+00 : f32
      %12 = vector.broadcast %cst_3 : f32 to vector<8x512xf32>
      %cst_4 = arith.constant 0.000000e+00 : f32
      %13 = vector.broadcast %cst_4 : f32 to vector<8x512xf32>
      %c0 = arith.constant 0 : index
      %c0_5 = arith.constant 0 : index
      %14 = vector.load %arg2[%c0, %c0_5] : memref<8x1536xf32, #tpu.memory_space<vmem>>, vector<8x96xf32>
      %cst_6 = arith.constant 0.000000e+00 : f32
      %15 = vector.broadcast %cst_6 : f32 to vector<8x416xf32>
      %16 = tpu.concatenate %14, %15 in 1 : vector<8x96xf32>, vector<8x416xf32> -> vector<8x512xf32>
      %c0_7 = arith.constant 0 : index
      %c0_8 = arith.constant 0 : index
      %17 = vector.load %arg3[%c0_7, %c0_8] : memref<2x1536xi32, #tpu.memory_space<vmem>>, vector<2x96xi32>
      %18 = arith.sitofp %17 : vector<2x96xi32> to vector<2x96xf32>
      %19 = vector.extract_strided_slice %18 {offsets = [0, 0], sizes = [1, 96], strides = [1, 1]} : vector<2x96xf32> to vector<1x96xf32>
      %cst_9 = arith.constant 0.000000e+00 : f32
      %20 = vector.broadcast %cst_9 : f32 to vector<1x96xf32>
      %21 = arith.cmpf oeq, %19, %20 : vector<1x96xf32>
      %22 = arith.extui %21 : vector<1x96xi1> to vector<1x96xi32>
      %23 = arith.sitofp %22 : vector<1x96xi32> to vector<1x96xf32>
      %cst_10 = arith.constant 1.000000e+00 : f32
      %24 = vector.broadcast %cst_10 : f32 to vector<1x96xf32>
      %25 = arith.cmpf oeq, %19, %24 : vector<1x96xf32>
      %26 = arith.extui %25 : vector<1x96xi1> to vector<1x96xi32>
      %27 = arith.sitofp %26 : vector<1x96xi32> to vector<1x96xf32>
      %cst_11 = arith.constant 2.000000e+00 : f32
      %28 = vector.broadcast %cst_11 : f32 to vector<1x96xf32>
      %29 = arith.cmpf oeq, %19, %28 : vector<1x96xf32>
      %30 = arith.extui %29 : vector<1x96xi1> to vector<1x96xi32>
      %31 = arith.sitofp %30 : vector<1x96xi32> to vector<1x96xf32>
      %cst_12 = arith.constant 3.000000e+00 : f32
      %32 = vector.broadcast %cst_12 : f32 to vector<1x96xf32>
      %33 = arith.cmpf oeq, %19, %32 : vector<1x96xf32>
      %34 = arith.extui %33 : vector<1x96xi1> to vector<1x96xi32>
      %35 = arith.sitofp %34 : vector<1x96xi32> to vector<1x96xf32>
      %36 = vector.extract_strided_slice %18 {offsets = [1, 0], sizes = [1, 96], strides = [1, 1]} : vector<2x96xf32> to vector<1x96xf32>
      %cst_13 = arith.constant 0.000000e+00 : f32
      %37 = vector.broadcast %cst_13 : f32 to vector<1x96xf32>
      %38 = arith.cmpf oeq, %36, %37 : vector<1x96xf32>
      %39 = arith.extui %38 : vector<1x96xi1> to vector<1x96xi32>
      %40 = arith.sitofp %39 : vector<1x96xi32> to vector<1x96xf32>
      %cst_14 = arith.constant 1.000000e+00 : f32
      %41 = vector.broadcast %cst_14 : f32 to vector<1x96xf32>
      %42 = arith.cmpf oeq, %36, %41 : vector<1x96xf32>
      %43 = arith.extui %42 : vector<1x96xi1> to vector<1x96xi32>
      %44 = arith.sitofp %43 : vector<1x96xi32> to vector<1x96xf32>
      %cst_15 = arith.constant 2.000000e+00 : f32
      %45 = vector.broadcast %cst_15 : f32 to vector<1x96xf32>
      %46 = arith.cmpf oeq, %36, %45 : vector<1x96xf32>
      %47 = arith.extui %46 : vector<1x96xi1> to vector<1x96xi32>
      %48 = arith.sitofp %47 : vector<1x96xi32> to vector<1x96xf32>
      %cst_16 = arith.constant 3.000000e+00 : f32
      %49 = vector.broadcast %cst_16 : f32 to vector<1x96xf32>
      %50 = arith.cmpf oeq, %36, %49 : vector<1x96xf32>
      %51 = arith.extui %50 : vector<1x96xi1> to vector<1x96xi32>
      %52 = arith.sitofp %51 : vector<1x96xi32> to vector<1x96xf32>
      %53 = tpu.concatenate %23, %27, %31, %35, %40, %44, %48, %52 in 0 : vector<1x96xf32>, vector<1x96xf32>, vector<1x96xf32>, vector<1x96xf32>, vector<1x96xf32>, vector<1x96xf32>, vector<1x96xf32>, vector<1x96xf32> -> vector<8x96xf32>
      %cst_17 = arith.constant 0.000000e+00 : f32
      %54 = vector.broadcast %cst_17 : f32 to vector<8x416xf32>
      %55 = tpu.concatenate %53, %54 in 1 : vector<8x96xf32>, vector<8x416xf32> -> vector<8x512xf32>
      %56 = arith.mulf %55, %16 : vector<8x512xf32>
      %57 = arith.addf %11, %56 : vector<8x512xf32>
      %58 = arith.addf %13, %55 : vector<8x512xf32>
      %59 = arith.mulf %16, %16 : vector<8x512xf32>
      %60 = arith.addf %12, %59 : vector<8x512xf32>
      %c0_18 = arith.constant 0 : index
      %c0_19 = arith.constant 0 : index
      %c0_20 = arith.constant 0 : index
      %c0_21 = arith.constant 0 : index
      %61 = vector.load %arg4[%c0_18, %c0_19, %c0_20, %c0_21] : memref<1x3x8x512xf32, #tpu.memory_space<vmem>>, vector<1x1x8x512xf32>
      %62 = vector.shape_cast %61 : vector<1x1x8x512xf32> to vector<8x512xf32>
      %63 = arith.addf %62, %57 : vector<8x512xf32>
      %c0_22 = arith.constant 0 : index
      %c0_23 = arith.constant 0 : index
      %c0_24 = arith.constant 0 : index
      %c0_25 = arith.constant 0 : index
      %64 = vector.load %arg4[%c0_22, %c0_23, %c0_24, %c0_25] : memref<1x3x8x512xf32, #tpu.memory_space<vmem>>, vector<1x1x8x512xf32>
      %65 = vector.shape_cast %64 : vector<1x1x8x512xf32> to vector<8x512xf32>
      %66 = vector.shape_cast %63 : vector<8x512xf32> to vector<1x1x8x512xf32>
      tpu.vector_store %arg4[%c0_22, %c0_23, %c0_24, %c0_25], %66 {strides = array<i32>} : memref<1x3x8x512xf32, #tpu.memory_space<vmem>>, vector<1x1x8x512xf32>,
      %c0_26 = arith.constant 0 : index
      %c1 = arith.constant 1 : index
      %c0_27 = arith.constant 0 : index
      %c0_28 = arith.constant 0 : index
      %67 = vector.load %arg4[%c0_26, %c1, %c0_27, %c0_28] : memref<1x3x8x512xf32, #tpu.memory_space<vmem>>, vector<1x1x8x512xf32>
      %68 = vector.shape_cast %67 : vector<1x1x8x512xf32> to vector<8x512xf32>
      %69 = arith.addf %68, %60 : vector<8x512xf32>
      %c0_29 = arith.constant 0 : index
      %c1_30 = arith.constant 1 : index
      %c0_31 = arith.constant 0 : index
      %c0_32 = arith.constant 0 : index
      %70 = vector.load %arg4[%c0_29, %c1_30, %c0_31, %c0_32] : memref<1x3x8x512xf32, #tpu.memory_space<vmem>>, vector<1x1x8x512xf32>
      %71 = vector.shape_cast %70 : vector<1x1x8x512xf32> to vector<8x512xf32>
      %72 = vector.shape_cast %69 : vector<8x512xf32> to vector<1x1x8x512xf32>
      tpu.vector_store %arg4[%c0_29, %c1_30, %c0_31, %c0_32], %72 {strides = array<i32>} : memref<1x3x8x512xf32, #tpu.memory_space<vmem>>, vector<1x1x8x512xf32>,
      %c0_33 = arith.constant 0 : index
      %c2 = arith.constant 2 : index
      %c0_34 = arith.constant 0 : index
      %c0_35 = arith.constant 0 : index
      %73 = vector.load %arg4[%c0_33, %c2, %c0_34, %c0_35] : memref<1x3x8x512xf32, #tpu.memory_space<vmem>>, vector<1x1x8x512xf32>
      %74 = vector.shape_cast %73 : vector<1x1x8x512xf32> to vector<8x512xf32>
      %75 = arith.addf %74, %58 : vector<8x512xf32>
      %c0_36 = arith.constant 0 : index
      %c2_37 = arith.constant 2 : index
      %c0_38 = arith.constant 0 : index
      %c0_39 = arith.constant 0 : index
      %76 = vector.load %arg4[%c0_36, %c2_37, %c0_38, %c0_39] : memref<1x3x8x512xf32, #tpu.memory_space<vmem>>, vector<1x1x8x512xf32>
      %77 = vector.shape_cast %76 : vector<1x1x8x512xf32> to vector<8x512xf32>
      %78 = vector.shape_cast %75 : vector<8x512xf32> to vector<1x1x8x512xf32>
      tpu.vector_store %arg4[%c0_36, %c2_37, %c0_38, %c0_39], %78 {strides = array<i32>} : memref<1x3x8x512xf32, #tpu.memory_space<vmem>>, vector<1x1x8x512xf32>,
    } else {
    }
    return
  }
  func.func @transform_0(%arg0: i32, %arg1: i32) -> (i32, i32) {
    %c3_i32 = arith.constant 3 : i32
    %0 = arith.muli %arg0, %c3_i32 : i32
    %1 = arith.addi %0, %arg1 : i32
    %c0_i32 = arith.constant 0 : i32
    %c0_i32_0 = arith.constant 0 : i32
    return %c0_i32, %1 : i32, i32
  }
  func.func @transform_1(%arg0: i32, %arg1: i32) -> (i32, i32) {
    %c3_i32 = arith.constant 3 : i32
    %0 = arith.muli %arg0, %c3_i32 : i32
    %1 = arith.addi %0, %arg1 : i32
    %c0_i32 = arith.constant 0 : i32
    %c0_i32_0 = arith.constant 0 : i32
    return %c0_i32, %1 : i32, i32
  }
  func.func @transform_2(%arg0: i32, %arg1: i32) -> (i32, i32, i32, i32) {
    %c0_i32 = arith.constant 0 : i32
    %c0_i32_0 = arith.constant 0 : i32
    %c0_i32_1 = arith.constant 0 : i32
    %c0_i32_2 = arith.constant 0 : i32
    return %arg0, %c0_i32, %c0_i32_0, %c0_i32_1 : i32, i32, i32, i32
  }
}

</mosaic_0001>

<bundles_post_ra>
// kernel: tpu_custom_call.1
= control target key start
LH: loop header
LB: loop body
LE: loop exit
PB: predicated region body
PF: predicated region fallthrough
CT: control target
= control target key end

     0   :  { %7 = vsyncpa [#allocation3], 0  ;;  %s1684_s0 = inlined_call_operand.hbm [shape: f32[8,3168], index: 0, kind: input, shape index: {}]   ;;  %s1685_s1 = inlined_call_operand.hbm [shape: s32[2,3168], index: 1, kind: input, shape index: {}]   ;;  %s1686_s2 = inlined_call_operand.hbm [shape: f32[1,3,8,512], index: 2, kind: output, shape index: {}]  }
   0x1   :  { %9 = vsyncpa [#allocation3 + $0x1], 0 }
   0x2   :  { %10 = vsyncpa [#allocation6], 0 }
   0x3   :  { %12 = vsyncpa [#allocation6 + $0x1], 0 }
   0x4   :  { %13 = vsyncpa [#allocation4], 0  ;;  %s1209_s9 = smov 0   ;;  %s1211_s10 = smov 0  }
   0x5   :  { %s1213_s11 = smov 0   ;;  %s1215_s12 = smov 0  }
   0x6   :  { %s1217_s13 = smov 0   ;;  %s1219_s14 = smov 0  }
   0x7 LB: > { %s915_s15 = sadd.s32 4294967295, %s1184_s14   ;;  %s28_s16 = sadd.s32 1, %s1180_s13  ;;  %s1184_s14 = sphi %s1219_s14, %s19_s14   ;;  %s1180_s13 = sphi %s1217_s13, %s1695_s13   ;;  %s1176_s12 = sphi %s1215_s12, %s1694_s12   ;;  %s1172_s11 = sphi %s1213_s11, %s1693_s11   ;;  %s1168_s10 = sphi %s1211_s10, %s1692_s10   ;;  %s1164_s9 = sphi %s1209_s9, %s1691_s9  }
   0x8   : > { %p29_p0 = scmp.ge.s32.totalorder %s28_s16, 3  ;;  %s42_s17 = sadd.s32 1, %s1172_s11 }
   0x9   : > { %p49_p1 = scmp.ne.s32.totalorder %s1172_s11, %s1168_s10  ;;  %p50_p2 = scmp.eq.s32.totalorder %s1184_s14, 0 }
   0xa   : > { %s1697_s16 = smov (%p29_p0, %s28_s16), 0  ;;  %p55_p4 = scmp.ne.s32.totalorder %s1168_s10, %s1164_s9 }
   0xb   : > { %p1245_p3 = por %p50_p2, %p49_p1  ;;  %s39_s19 = ssub.s32 %s1180_s13, %s1697_s16 }
   0xc   : > { %p56_p5 = scmp.eq.s32.totalorder %s915_s15, 0  ;;  %p40_p6 = scmp.eq.s32.totalorder %s39_s19, 0 }
   0xd   : > { %p917_p8 = scmp.ge.s32.totalorder %s1184_s14, 3 }
   0xe   : > { %p1254_p7 = por %p56_p5, %p55_p4 }
   0xf   : > { %s1259_s21 = scalar_select %p40_p6, %s1172_s11, %s42_s17  }
  0x10   : > { %131 = sbr.rel (%p917_p8) target bundleno = 95 (0x5f), region = 16 }
  0x15   : > { %134 = sbr.rel (!%p1245_p3) target bundleno = 58 (0x3a), region = 20  ;;  %s135_s22 = sand.u32 (%p1245_p3), 1, %s1172_s11  }
  0x16   : > { %s142_s23 = smul.u32 (%p1245_p3), 12, %s1180_s13  ;;  %s1269_s29 = scalar_lea.sflag (%p1245_p3), [#allocation3], %s135_s22 }
  0x17   : > { %s954_s24 = smul.u32 (%p1245_p3), 96, %s135_s22 }
  0x18   : > { %s143_s25 = ssub.s32 (%p1245_p3), 25, %s142_s23 }
  0x19   : > { %p144_p9 = scmp.lt.s32.totalorder (%p1245_p3), %s143_s25, 12  ;;  %s139_s30 = scalar_lea.vmem (%p1245_p3), [#allocation2], %s954_s24 }
  0x1b   : > { %s1699_s25 = smov (!%p144_p9, %s143_s25), 12 }
  0x1c   : > { %s918_s26 = sshll.u32 %s1699_s25, 3 }
  0x1d   : > { %s147_s27 = ssub.s32 96, %s918_s26 }
  0x1e   : > { %s148_s28 = sshll.u32 %s147_s27, 4 }
  0x1f   : > { %149 = vsyncadd %s1269_s29, %s148_s28  ;;  %p1272_p10 = scmp.ne.s32.totalorder %s918_s26, 0  ;;  %s952_s4 = smul.u32 96, %s1180_s13 }
  0x20   : > { %s922_s5 = sshll.u32 %s1699_s25, 7  ;;  %s1278_s6 = sshll.u32 %s139_s30, 4  ;;  %s158_s6 = int_to_ptr.vmem [resolvable:$true] %s1278_s6 }
  0x21   : > { %s152_s9 = scalar_lea.hbm %s1684_s0, %s952_s4  ;;  %s1022_s22 = sshrl.u32 %s922_s5, 4 }
  0x22   : > { %s155_s17 = sshll.u32 %s152_s9, 4  ;;  %s1031_s27 = scalar_lea.hbm %s1684_s0, 200  ;;  %s156_s17 = int_to_ptr.hbm [resolvable:$true] %s155_s17 }
  0x23   : > { %s1020_s19 = sshra.s32 %s156_s17, 4  ;;  %s1021_s19 = int_to_ptr.hbm [resolvable:$true] %s1020_s19 }
  0x24   : > { %s1027_s23 = scalar_lea.hbm %s1021_s19, %s1022_s22 }
  0x25   : > { %p1028_p11 = scmp.ne.s32.totalorder %s1021_s19, %s1027_s23  ;;  %p1033_p0 = scmp.lt.s32.totalorder %s1031_s27, %s1027_s23 }
  0x27   : > { %p1029_p12 = pnand %p1028_p11, %p1272_p10 }
  0x29   : > { %p1030_p13 = pneg %p1029_p12 }
  0x2b   : > { %p1035_p1 = pnand %p1033_p0, %p1030_p13 }
  0x2d   : > { %1038 = shalt.err (!%p1035_p1)
}
  0x2e   : > { %s1039_s28 = sshra.s32 %s158_s6, 4  ;;  %s1186_s4 = smov [#allocation2]   ;;  %s1040_s28 = int_to_ptr.vmem [resolvable:$true] %s1039_s28 }
  0x2f   : > { %s1046_s30 = scalar_lea.vmem %s1040_s28, %s1022_s22  ;;  %s1050_s7 = scalar_lea.vmem %s1186_s4, 192 }
  0x30   : > { %p1047_p2 = scmp.ne.s32.totalorder %s1040_s28, %s1046_s30  ;;  %p1052_p6 = scmp.lt.s32.totalorder %s1050_s7, %s1046_s30 }
  0x32   : > { %p1048_p4 = pnand %p1047_p2, %p1272_p10 }
  0x34   : > { %p1049_p5 = pneg %p1048_p4 }
  0x36   : > { %p1054_p8 = pnand %p1052_p6, %p1049_p5 }
  0x38   : > { %1057 = shalt.err (!%p1054_p8)
}
  0x39   : > { %160 = dma.hbm_to_vmem [thread:$0]  (%p1272_p10), %s156_s17, %s922_s5, %s158_s6, %s1269_s29  }
  0x3a PF: > { %163 = sbr.rel (!%p1245_p3) target bundleno = 95 (0x5f), region = 24  ;;  %s164_s8 = sand.u32 (%p1245_p3), 1, %s1172_s11  }
  0x3b   : > { %s171_s9 = smul.u32 (%p1245_p3), 12, %s1180_s13  ;;  %s1305_s26 = scalar_lea.sflag (%p1245_p3), [#allocation6], %s164_s8 }
  0x3c   : > { %s955_s19 = smul.u32 (%p1245_p3), 24, %s164_s8 }
  0x3d   : > { %s172_s22 = ssub.s32 (%p1245_p3), 25, %s171_s9 }
  0x3e   : > { %p173_p9 = scmp.lt.s32.totalorder (%p1245_p3), %s172_s22, 12  ;;  %s168_s25 = scalar_lea.vmem (%p1245_p3), [#allocation5], %s955_s19 }
  0x40   : > { %s1701_s22 = smov (!%p173_p9, %s172_s22), 12 }
  0x41   : > { %s923_s23 = sshll.u32 %s1701_s22, 1 }
  0x42   : > { %s176_s3 = ssub.s32 24, %s923_s23 }
  0x43   : > { %s177_s24 = sshll.u32 %s176_s3, 4 }
  0x44   : > { %178 = vsyncadd %s1305_s26, %s177_s24  ;;  %p1308_p3 = scmp.ne.s32.totalorder %s923_s23, 0  ;;  %s953_s29 = smul.u32 24, %s1180_s13 }
  0x45   : > { %s927_s5 = sshll.u32 %s1701_s22, 5  ;;  %s1314_s6 = sshll.u32 %s168_s25, 4  ;;  %s187_s6 = int_to_ptr.vmem [resolvable:$true] %s1314_s6 }
  0x46   : > { %s181_s28 = scalar_lea.hbm %s1685_s1, %s953_s29  ;;  %s1061_s7 = sshrl.u32 %s927_s5, 4 }
  0x47   : > { %s184_s30 = sshll.u32 %s181_s28, 4  ;;  %s1070_s23 = scalar_lea.hbm %s1685_s1, 50  ;;  %s185_s30 = int_to_ptr.hbm [resolvable:$true] %s184_s30 }
  0x48   : > { %s1059_s4 = sshra.s32 %s185_s30, 4  ;;  %s1060_s4 = int_to_ptr.hbm [resolvable:$true] %s1059_s4 }
  0x49   : > { %s1066_s8 = scalar_lea.hbm %s1060_s4, %s1061_s7 }
  0x4a   : > { %p1067_p10 = scmp.ne.s32.totalorder %s1060_s4, %s1066_s8  ;;  %p1072_p13 = scmp.lt.s32.totalorder %s1070_s23, %s1066_s8 }
  0x4c   : > { %p1068_p11 = pnand %p1067_p10, %p1308_p3 }
  0x4e   : > { %p1069_p12 = pneg %p1068_p11 }
  0x50   : > { %p1074_p0 = pnand %p1072_p13, %p1069_p12 }
  0x52   : > { %1077 = shalt.err (!%p1074_p0)
}
  0x53   : > { %s1078_s3 = sshra.s32 %s187_s6, 4  ;;  %s1187_s25 = smov [#allocation5]   ;;  %s1079_s3 = int_to_ptr.vmem [resolvable:$true] %s1078_s3 }
  0x54   : > { %s1085_s24 = scalar_lea.vmem %s1079_s3, %s1061_s7  ;;  %s1089_s29 = scalar_lea.vmem %s1187_s25, 48 }
  0x55   : > { %p1086_p1 = scmp.ne.s32.totalorder %s1079_s3, %s1085_s24  ;;  %p1091_p5 = scmp.lt.s32.totalorder %s1089_s29, %s1085_s24 }
  0x57   : > { %p1087_p2 = pnand %p1086_p1, %p1308_p3 }
  0x59   : > { %p1088_p4 = pneg %p1087_p2 }
  0x5b   : > { %p1093_p6 = pnand %p1091_p5, %p1088_p4 }
  0x5d   : > { %1096 = shalt.err (!%p1093_p6)
}
  0x5e   : > { %189 = dma.hbm_to_vmem [thread:$0]  (%p1308_p3), %s185_s30, %s927_s5, %s187_s6, %s1305_s26  }
  0x5f PF: > { %p928_p8 = scmp.ge.s32.totalorder %s1184_s14, 1  ;;  %p191_p9 = scmp.lt.s32.totalorder %s1184_s14, 4 }
  0x61   : > { %p192_p10 = pnand %p928_p8, %p191_p9 }
  0x62   : > { %s197_s17 = sand.u32 (!%p192_p10), 1, %s1168_s10  }
  0x63   : > { %195 = sbr.rel (%p192_p10) target bundleno = 245 (0xf5), region = 28  ;;  %s198_s28 = scalar_lea.sflag (!%p192_p10), [#allocation3], %s197_s17 }
  0x64   : > { %s956_s27 = smul.u32 (!%p192_p10), 96, %s197_s17 }
  0x66   : > { %s1337_s4 = scalar_lea.vmem (!%p192_p10), [#allocation2], %s956_s27 }
  0x68   : > { %1151 = dma.done.wait (%p1254_p7), %s198_s28, 1536  }
  0x69   : > { %1153 = vsyncadd (%p1254_p7), %s198_s28, 4294965760  ;;  %s957_s22 = smul.u32 24, %s197_s17  ;;  %s208_s26 = scalar_lea.sflag [#allocation6], %s197_s17 }
  0x6b   : > { %s1343_s18 = scalar_lea.vmem [#allocation5], %s957_s22 }
  0x6c   : > { %1155 = dma.done.wait (%p1254_p7), %s208_s26, 384  }
  0x6d   : > { %1157 = vsyncadd (%p1254_p7), %s208_s26, 4294966912  ;;  %p929_p3 = scmp.ne.s32.totalorder %s1176_s12, 0 }
  0x6f   : > { %250 = sbr.rel (%p929_p3) target bundleno = 129 (0x81), region = 40 }
  0x74   : > { %v1188_v0 = vmov 0.0  }
  0x75   : > { %251 = vst [vmem:[#allocation7] sm:$0xff] %v1188_v0 }
  0x76   : > { %252 = vst [vmem:[#allocation7 + $0x8] sm:$0xff] %v1188_v0 }
  0x77   : > { %253 = vst [vmem:[#allocation7 + $0x10] sm:$0xff] %v1188_v0 }
  0x78   : > { %254 = vst [vmem:[#allocation7 + $0x18] sm:$0xff] %v1188_v0 }
  0x79   : > { %255 = vst [vmem:[#allocation7 + $0x20] sm:$0xff] %v1188_v0 }
  0x7a   : > { %256 = vst [vmem:[#allocation7 + $0x28] sm:$0xff] %v1188_v0 }
  0x7b   : > { %257 = vst [vmem:[#allocation7 + $0x30] sm:$0xff] %v1188_v0 }
  0x7c   : > { %258 = vst [vmem:[#allocation7 + $0x38] sm:$0xff] %v1188_v0 }
  0x7d   : > { %259 = vst [vmem:[#allocation7 + $0x40] sm:$0xff] %v1188_v0 }
  0x7e   : > { %260 = vst [vmem:[#allocation7 + $0x48] sm:$0xff] %v1188_v0 }
  0x7f   : > { %261 = vst [vmem:[#allocation7 + $0x50] sm:$0xff] %v1188_v0 }
  0x80   : > { %262 = vst [vmem:[#allocation7 + $0x58] sm:$0xff] %v1188_v0 }
  0x81 PF: > { %p930_p11 = scmp.eq.s32.totalorder %s1176_s12, 2 }
  0x83   : > { %269 = sbr.rel (%p930_p11) target bundleno = 211 (0xd3), region = 44 }
  0x88   : > { %v274_v1 = vld [vmem:[%s1343_s18] sm:$0xff]  ;;  %vm356_vm0 = vcmask 1040384   ;;  %vm361_vm1 = vcmask 1041408   ;;  %vm366_vm2 = vcmask 1042432   ;;  %vm371_vm3 = vcmask 1043456   ;;  %v415_v3 = vld [vmem:[%s1343_s18 + $0x8] sm:$0xff] }
  0x89   : > { %v275_v2 = vcvt.s32.f32 %v274_v1  ;;  %vm376_vm4 = vcmask 1044480   ;;  %vm381_vm5 = vcmask 1045504   ;;  %vm386_vm6 = vcmask 1046528   ;;  %v549_v26 = vld [vmem:[%s1343_s18 + $0x10] sm:$0xff]  ;;  %v1387_v31 = vld [vmem:[%s1337_s4] sm:$0xff] }
  0x8a   : > { %v416_v4 = vcvt.s32.f32 %v415_v3  ;;  %v1189_v5 = vmov 0.0   ;;  %v550_v39 = vcvt.s32.f32 %v549_v26  ;;  %v1411_v49 = vld [vmem:[%s1337_s4 + $0x20] sm:$0xff] }
  0x8b   : > { %vm276_vm7 = vcmp.eq.f32.partialorder %v275_v2, 0.0  ;;  %vm279_vm8 = vcmp.eq.f32.partialorder %v275_v2, 1.0  ;;  %vm282_vm9 = vcmp.eq.f32.partialorder %v275_v2, 2.0  ;;  %vm285_vm10 = vcmp.eq.f32.partialorder %v275_v2, 3.0 }
  0x8c   : > { %v1353_v6 = vsel %vm276_vm7, 1.0, %v1189_v5  ;;  %v1355_v7 = vsel %vm279_vm8, 1.0, %v1189_v5  ;;  %v1357_v8 = vsel %vm282_vm9, 1.0, %v1189_v5  ;;  %v1359_v9 = vsel %vm285_vm10, 1.0, %v1189_v5 }
  0x8d   : > { %v289_v10 = vperm.slane %v1353_v6, 0  ;;  %v298_v11 = vperm.slane %v1355_v7, 0  ;;  %v307_v12 = vperm.slane %v1357_v8, 0  ;;  %v316_v13 = vperm.slane %v1359_v9, 0 }
  0x8e   : > { %v324_v14 = vperm.slane %v1353_v6, 1  ;;  %v332_v15 = vperm.slane %v1355_v7, 1  ;;  %v340_v16 = vperm.slane %v1357_v8, 1  ;;  %v348_v17 = vperm.slane %v1359_v9, 1 }
  0x8f   : > { %v357_v18 = vsel %vm356_vm0, %v289_v10, %v298_v11  ;;  %vm417_vm11 = vcmp.eq.f32.partialorder %v416_v4, 0.0  ;;  %vm420_vm12 = vcmp.eq.f32.partialorder %v416_v4, 1.0  ;;  %vm423_vm13 = vcmp.eq.f32.partialorder %v416_v4, 2.0 }
  0x90   : > { %v362_v19 = vsel %vm361_vm1, %v357_v18, %v307_v12  ;;  %v1371_v20 = vsel %vm417_vm11, 1.0, %v1189_v5  ;;  %v1373_v21 = vsel %vm420_vm12, 1.0, %v1189_v5  ;;  %v1375_v22 = vsel %vm423_vm13, 1.0, %v1189_v5 }
  0x91   : > { %v367_v23 = vsel %vm366_vm2, %v362_v19, %v316_v13  ;;  %vm426_vm14 = vcmp.eq.f32.partialorder %v416_v4, 3.0  ;;  %v430_v24 = vperm.slane %v1371_v20, 0  ;;  %v439_v25 = vperm.slane %v1373_v21, 0 }
  0x92   : > { %v372_v27 = vsel %vm371_vm3, %v367_v23, %v324_v14  ;;  %v1382_v28 = vsel %vm426_vm14, 1.0, %v1189_v5  ;;  %v448_v29 = vperm.slane %v1375_v22, 0  ;;  %v465_v30 = vperm.slane %v1371_v20, 1 }
  0x93   : > { %v377_v32 = vsel %vm376_vm4, %v372_v27, %v332_v15  ;;  %v457_v33 = vperm.slane %v1382_v28, 0  ;;  %v473_v34 = vperm.slane %v1373_v21, 1  ;;  %v481_v35 = vperm.slane %v1375_v22, 1 }
  0x94   : > { %v382_v36 = vsel %vm381_vm5, %v377_v32, %v340_v16  ;;  %v489_v37 = vperm.slane %v1382_v28, 1  ;;  %v497_v38 = vsel %vm356_vm0, %v430_v24, %v439_v25  ;;  %v290_v42 = vperm.slane %v1353_v6, 2 }
  0x95   : > { %v1397_v40 = vsel %vm386_vm6, %v382_v36, %v348_v17  ;;  %v501_v41 = vsel %vm361_vm1, %v497_v38, %v448_v29  ;;  %v299_v43 = vperm.slane %v1355_v7, 2  ;;  %vm551_vm15 = vcmp.eq.f32.partialorder %v550_v39, 0.0  ;;  %v1445_v17 = vld [vmem:[%s1337_s4 + $0x40] sm:$0xff]  ;;  %v1464_v36 = vld [vmem:[%s1337_s4 + $0x8] sm:$0xff] }
  0x96   : > { %v391_v44 = vmul.f32 %v1397_v40, %v1387_v31  ;;  %v505_v45 = vsel %vm366_vm2, %v501_v41, %v457_v33  ;;  %vm554_vm7 = vcmp.eq.f32.partialorder %v550_v39, 1.0  ;;  %v1406_v47 = vsel %vm551_vm15, 1.0, %v1189_v5  ;;  %v679_v41 = vld [vmem:[#allocation7] sm:$0xff] }
  0x97   : > { %v509_v46 = vsel %vm371_vm3, %v505_v45, %v465_v30  ;;  %v1408_v48 = vsel %vm554_vm7, 1.0, %v1189_v5  ;;  %vm557_vm8 = vcmp.eq.f32.partialorder %v550_v39, 2.0  ;;  %vm560_vm9 = vcmp.eq.f32.partialorder %v550_v39, 3.0 }
  0x98   : > { %v513_v50 = vsel %vm376_vm4, %v509_v46, %v473_v34  ;;  %v1414_v51 = vsel %vm557_vm8, 1.0, %v1189_v5  ;;  %v564_v52 = vperm.slane %v1406_v47, 0  ;;  %v1418_v54 = vsel %vm560_vm9, 1.0, %v1189_v5 }
  0x99   : > { %v517_v53 = vsel %vm381_vm5, %v513_v50, %v481_v35  ;;  %v573_v55 = vperm.slane %v1408_v48, 0  ;;  %v582_v56 = vperm.slane %v1414_v51, 0  ;;  %v591_v58 = vperm.slane %v1418_v54, 0 }
  0x9a   : > { %v1423_v57 = vsel %vm386_vm6, %v517_v53, %v489_v37  ;;  %v599_v59 = vperm.slane %v1406_v47, 1  ;;  %v607_v60 = vperm.slane %v1408_v48, 1  ;;  %v615_v62 = vperm.slane %v1414_v51, 1 }
  0x9b   : > { %v525_v61 = vmul.f32 %v1423_v57, %v1411_v49  ;;  %v623_v63 = vperm.slane %v1418_v54, 1  ;;  %v631_v0 = vsel %vm356_vm0, %v564_v52, %v573_v55  ;;  %v308_v2 = vperm.slane %v1357_v8, 2 }
  0x9c   : > { %v635_v1 = vsel %vm361_vm1, %v631_v0, %v582_v56  ;;  %v317_v3 = vperm.slane %v1359_v9, 2  ;;  %v325_v4 = vperm.slane %v1353_v6, 3  ;;  %v333_v11 = vperm.slane %v1355_v7, 3 }
  0x9d   : > { %v529_v5 = vadd.f32 %v525_v61, %v391_v44  ;;  %v639_v10 = vsel %vm366_vm2, %v635_v1, %v591_v58  ;;  %v341_v12 = vperm.slane %v1357_v8, 3  ;;  %v349_v14 = vperm.slane %v1359_v9, 3  ;;  %v1484_v61 = vld [vmem:[%s1337_s4 + $0x28] sm:$0xff] }
  0x9e   : > { %v643_v13 = vsel %vm371_vm3, %v639_v10, %v599_v59  ;;  %v358_v15 = vsel %vm356_vm0, %v290_v42, %v299_v43  ;;  %v431_v16 = vperm.slane %v1371_v20, 2  ;;  %v440_v23 = vperm.slane %v1373_v21, 2 }
  0x9f   : > { %v647_v18 = vsel %vm376_vm4, %v643_v13, %v607_v60  ;;  %v363_v19 = vsel %vm361_vm1, %v358_v15, %v308_v2  ;;  %v449_v24 = vperm.slane %v1375_v22, 2  ;;  %v458_v27 = vperm.slane %v1382_v28, 2 }
  0xa0   : > { %v651_v25 = vsel %vm381_vm5, %v647_v18, %v615_v62  ;;  %v368_v26 = vsel %vm366_vm2, %v363_v19, %v317_v3  ;;  %v466_v29 = vperm.slane %v1371_v20, 3  ;;  %v474_v33 = vperm.slane %v1373_v21, 3 }
  0xa1   : > { %v1456_v30 = vsel %vm386_vm6, %v651_v25, %v623_v63  ;;  %v373_v32 = vsel %vm371_vm3, %v368_v26, %v325_v4  ;;  %v482_v34 = vperm.slane %v1375_v22, 3  ;;  %v490_v38 = vperm.slane %v1382_v28, 3  ;;  %v1509_v26 = vld [vmem:[%s1337_s4 + $0x48] sm:$0xff] }
  0xa2   : > { %v659_v35 = vmul.f32 %v1456_v30, %v1445_v17  ;;  %v378_v37 = vsel %vm376_vm4, %v373_v32, %v333_v11  ;;  %v498_v39 = vsel %vm356_vm0, %v431_v16, %v440_v23  ;;  %v565_v44 = vperm.slane %v1406_v47, 2 }
  0xa3   : > { %v383_v42 = vsel %vm381_vm5, %v378_v37, %v341_v12  ;;  %v502_v43 = vsel %vm361_vm1, %v498_v39, %v449_v24  ;;  %v574_v45 = vperm.slane %v1408_v48, 2  ;;  %v583_v53 = vperm.slane %v1414_v51, 2 }
  0xa4   : > { %v663_v46 = vadd.f32 %v659_v35, %v529_v5  ;;  %v1474_v50 = vsel %vm386_vm6, %v383_v42, %v349_v14  ;;  %v506_v52 = vsel %vm366_vm2, %v502_v43, %v458_v27  ;;  %v592_v58 = vperm.slane %v1418_v54, 2 }
  0xa5   : > { %v392_v55 = vmul.f32 %v1474_v50, %v1464_v36  ;;  %v510_v56 = vsel %vm371_vm3, %v506_v52, %v466_v29  ;;  %v600_v59 = vperm.slane %v1406_v47, 3  ;;  %v608_v63 = vperm.slane %v1408_v48, 3  ;;  %v680_v52 = vld [vmem:[#allocation7 + $0x8] sm:$0xff] }
  0xa6   : > { %v683_v60 = vadd.f32 %v679_v41, %v663_v46  ;;  %v514_v62 = vsel %vm376_vm4, %v510_v56, %v474_v33  ;;  %v616_v0 = vperm.slane %v1414_v51, 3  ;;  %v624_v2 = vperm.slane %v1418_v54, 3 }
  0xa7   : > { %v518_v1 = vsel %vm381_vm5, %v514_v62, %v482_v34  ;;  %v632_v3 = vsel %vm356_vm0, %v565_v44, %v574_v45  ;;  %v291_v4 = vperm.slane %v1353_v6, 4  ;;  %v300_v11 = vperm.slane %v1355_v7, 4 }
  0xa8   : > { %687 = vst [vmem:[#allocation7] sm:$0xff] %v683_v60  ;;  %v1494_v5 = vsel %vm386_vm6, %v518_v1, %v490_v38  ;;  %v636_v10 = vsel %vm361_vm1, %v632_v3, %v583_v53  ;;  %v309_v12 = vperm.slane %v1357_v8, 4  ;;  %v318_v15 = vperm.slane %v1359_v9, 4  ;;  %v1530_v53 = vld [vmem:[%s1337_s4 + $0x10] sm:$0xff] }
  0xa9   : > { %v526_v13 = vmul.f32 %v1494_v5, %v1484_v61  ;;  %v640_v14 = vsel %vm366_vm2, %v636_v10, %v592_v58  ;;  %v326_v16 = vperm.slane %v1353_v6, 5  ;;  %v334_v19 = vperm.slane %v1355_v7, 5 }
  0xaa   : > { %v644_v18 = vsel %vm371_vm3, %v640_v14, %v600_v59  ;;  %v342_v23 = vperm.slane %v1357_v8, 5  ;;  %v350_v24 = vperm.slane %v1359_v9, 5  ;;  %v359_v29 = vsel %vm356_vm0, %v291_v4, %v300_v11  ;;  %v1550_v14 = vld [vmem:[%s1337_s4 + $0x30] sm:$0xff] }
  0xab   : > { %v530_v25 = vadd.f32 %v526_v13, %v392_v55  ;;  %v648_v27 = vsel %vm376_vm4, %v644_v18, %v608_v63  ;;  %v432_v32 = vperm.slane %v1371_v20, 4  ;;  %v364_v34 = vsel %vm361_vm1, %v359_v29, %v309_v12 }
  0xac   : > { %v652_v33 = vsel %vm381_vm5, %v648_v27, %v616_v0  ;;  %v441_v35 = vperm.slane %v1373_v21, 4  ;;  %v450_v37 = vperm.slane %v1375_v22, 4  ;;  %v369_v39 = vsel %vm366_vm2, %v364_v34, %v318_v15 }
  0xad   : > { %v1519_v38 = vsel %vm386_vm6, %v652_v33, %v624_v2  ;;  %v459_v41 = vperm.slane %v1382_v28, 4  ;;  %v467_v42 = vperm.slane %v1371_v20, 5  ;;  %v374_v44 = vsel %vm371_vm3, %v369_v39, %v326_v16 }
  0xae   : > { %v660_v43 = vmul.f32 %v1519_v38, %v1509_v26  ;;  %v475_v45 = vperm.slane %v1373_v21, 5  ;;  %v483_v46 = vperm.slane %v1375_v22, 5  ;;  %v379_v55 = vsel %vm376_vm4, %v374_v44, %v334_v19 }
  0xaf   : > { %v491_v56 = vperm.slane %v1382_v28, 5  ;;  %v499_v58 = vsel %vm356_vm0, %v432_v32, %v441_v35  ;;  %v566_v59 = vperm.slane %v1406_v47, 4  ;;  %v384_v62 = vsel %vm381_vm5, %v379_v55, %v342_v23 }
  0xb0   : > { %v664_v60 = vadd.f32 %v660_v43, %v530_v25  ;;  %v503_v63 = vsel %vm361_vm1, %v499_v58, %v450_v37  ;;  %v575_v0 = vperm.slane %v1408_v48, 4  ;;  %v1540_v1 = vsel %vm386_vm6, %v384_v62, %v350_v24 }
  0xb1   : > { %v507_v2 = vsel %vm366_vm2, %v503_v63, %v459_v41  ;;  %v584_v3 = vperm.slane %v1414_v51, 4  ;;  %v593_v4 = vperm.slane %v1418_v54, 4  ;;  %v393_v11 = vmul.f32 %v1540_v1, %v1530_v53 }
  0xb2   : > { %v684_v10 = vadd.f32 %v680_v52, %v664_v60  ;;  %v511_v12 = vsel %vm371_vm3, %v507_v2, %v467_v42  ;;  %v601_v13 = vperm.slane %v1406_v47, 5  ;;  %v609_v16 = vperm.slane %v1408_v48, 5  ;;  %v1576_v52 = vld [vmem:[%s1337_s4 + $0x50] sm:$0xff]  ;;  %v273_v2 = vld [vmem:[%s1337_s4 + $0x18] sm:$0xff] }
  0xb3   : > { %v515_v15 = vsel %vm376_vm4, %v511_v12, %v475_v45  ;;  %v617_v18 = vperm.slane %v1414_v51, 5  ;;  %v625_v19 = vperm.slane %v1418_v54, 5  ;;  %v633_v24 = vsel %vm356_vm0, %v566_v59, %v575_v0 }
  0xb4   : > { %688 = vst [vmem:[#allocation7 + $0x8] sm:$0xff] %v684_v10  ;;  %v519_v23 = vsel %vm381_vm5, %v515_v15, %v483_v46  ;;  %v292_v25 = vperm.slane %v1353_v6, 6  ;;  %v301_v27 = vperm.slane %v1355_v7, 6  ;;  %v637_v32 = vsel %vm361_vm1, %v633_v24, %v584_v3 }
  0xb5   : > { %v1561_v29 = vsel %vm386_vm6, %v519_v23, %v491_v56  ;;  %v310_v33 = vperm.slane %v1357_v8, 6  ;;  %v319_v34 = vperm.slane %v1359_v9, 6  ;;  %v641_v37 = vsel %vm366_vm2, %v637_v32, %v593_v4 }
  0xb6   : > { %v527_v35 = vmul.f32 %v1561_v29, %v1550_v14  ;;  %v327_v39 = vperm.slane %v1353_v6, 7  ;;  %v335_v41 = vperm.slane %v1355_v7, 7  ;;  %v645_v42 = vsel %vm371_vm3, %v641_v37, %v601_v13 }
  0xb7   : > { %v343_v43 = vperm.slane %v1357_v8, 7  ;;  %v351_v44 = vperm.slane %v1359_v9, 7  ;;  %v360_v45 = vsel %vm356_vm0, %v292_v25, %v301_v27  ;;  %v649_v55 = vsel %vm376_vm4, %v645_v42, %v609_v16 }
  0xb8   : > { %v531_v46 = vadd.f32 %v527_v35, %v393_v11  ;;  %v365_v56 = vsel %vm361_vm1, %v360_v45, %v310_v33  ;;  %v433_v6 = vperm.slane %v1371_v20, 6  ;;  %v653_v7 = vsel %vm381_vm5, %v649_v55, %v617_v18  ;;  %v681_v11 = vld [vmem:[#allocation7 + $0x10] sm:$0xff] }
  0xb9   : > { %v370_v58 = vsel %vm366_vm2, %v365_v56, %v319_v34  ;;  %v442_v8 = vperm.slane %v1373_v21, 6  ;;  %v451_v9 = vperm.slane %v1375_v22, 6  ;;  %v1586_v59 = vsel %vm386_vm6, %v653_v7, %v625_v19  ;;  %v414_v34 = vld [vmem:[%s1337_s4 + $0x38] sm:$0xff]  ;;  %v692_v7 = vld [vmem:[#allocation7 + $0x20] sm:$0xff] }
  0xba   : > { %v375_v60 = vsel %vm371_vm3, %v370_v58, %v327_v39  ;;  %v460_v62 = vperm.slane %v1382_v28, 6  ;;  %v468_v63 = vperm.slane %v1371_v20, 7  ;;  %v661_v0 = vmul.f32 %v1586_v59, %v1576_v52 }
  0xbb   : > { %v380_v3 = vsel %vm376_vm4, %v375_v60, %v335_v41  ;;  %v476_v4 = vperm.slane %v1373_v21, 7  ;;  %v484_v10 = vperm.slane %v1375_v22, 7  ;;  %v492_v13 = vperm.slane %v1382_v28, 7 }
  0xbc   : > { %v385_v12 = vsel %vm381_vm5, %v380_v3, %v343_v43  ;;  %v500_v15 = vsel %vm356_vm0, %v433_v6, %v442_v8  ;;  %v567_v20 = vperm.slane %v1406_v47, 6  ;;  %v665_v16 = vadd.f32 %v661_v0, %v531_v46  ;;  %v548_v6 = vld [vmem:[%s1337_s4 + $0x58] sm:$0xff] }
  0xbd   : > { %v1602_v18 = vsel %vm386_vm6, %v385_v12, %v351_v44  ;;  %v504_v19 = vsel %vm361_vm1, %v500_v15, %v451_v9  ;;  %v576_v21 = vperm.slane %v1408_v48, 6  ;;  %v585_v24 = vperm.slane %v1414_v51, 6 }
  0xbe   : > { %v394_v22 = vmul.f32 %v1602_v18, %v273_v2  ;;  %v508_v23 = vsel %vm366_vm2, %v504_v19, %v460_v62  ;;  %v594_v28 = vperm.slane %v1418_v54, 6  ;;  %v685_v25 = vadd.f32 %v681_v11, %v665_v16 }
  0xbf   : > { %v512_v27 = vsel %vm371_vm3, %v508_v23, %v468_v63  ;;  %v602_v32 = vperm.slane %v1406_v47, 7  ;;  %v610_v33 = vperm.slane %v1408_v48, 7  ;;  %v618_v37 = vperm.slane %v1414_v51, 7  ;;  %v693_v63 = vld [vmem:[#allocation7 + $0x28] sm:$0xff] }
  0xc0   : > { %v516_v35 = vsel %vm376_vm4, %v512_v27, %v476_v4  ;;  %v626_v39 = vperm.slane %v1418_v54, 7  ;;  %v634_v41 = vsel %vm356_vm0, %v567_v20, %v576_v21  ;;  %689 = vst [vmem:[#allocation7 + $0x10] sm:$0xff] %v685_v25  ;;  %v403_v47 = vmul.f32 %v1387_v31, %v1387_v31 }
  0xc1   : > { %v520_v42 = vsel %vm381_vm5, %v516_v35, %v484_v10  ;;  %v638_v43 = vsel %vm361_vm1, %v634_v41, %v585_v24  ;;  %v537_v48 = vmul.f32 %v1411_v49, %v1411_v49  ;;  %v671_v54 = vmul.f32 %v1445_v17, %v1445_v17 }
  0xc2   : > { %v524_v44 = vsel %vm386_vm6, %v520_v42, %v492_v13  ;;  %v642_v51 = vsel %vm366_vm2, %v638_v43, %v594_v28  ;;  %v404_v45 = vmul.f32 %v1464_v36, %v1464_v36  ;;  %v538_v31 = vmul.f32 %v1484_v61, %v1484_v61  ;;  %v682_v13 = vld [vmem:[#allocation7 + $0x18] sm:$0xff] }
  0xc3   : > { %v528_v46 = vmul.f32 %v524_v44, %v414_v34  ;;  %v646_v55 = vsel %vm371_vm3, %v642_v51, %v602_v32  ;;  %v541_v56 = vadd.f32 %v537_v48, %v403_v47  ;;  %v672_v58 = vmul.f32 %v1509_v26, %v1509_v26  ;;  %v695_v28 = vld [vmem:[#allocation7 + $0x38] sm:$0xff]  ;;  %v707_v32 = vld [vmem:[#allocation7 + $0x50] sm:$0xff] }
  0xc4   : > { %v650_v49 = vsel %vm376_vm4, %v646_v55, %v610_v33  ;;  %v405_v17 = vmul.f32 %v1530_v53, %v1530_v53  ;;  %v539_v36 = vmul.f32 %v1550_v14, %v1550_v14  ;;  %v542_v62 = vadd.f32 %v538_v31, %v404_v45  ;;  %v694_v53 = vld [vmem:[#allocation7 + $0x30] sm:$0xff]  ;;  %v708_v33 = vld [vmem:[#allocation7 + $0x58] sm:$0xff] }
  0xc5   : > { %v532_v8 = vadd.f32 %v528_v46, %v394_v22  ;;  %v654_v9 = vsel %vm381_vm5, %v650_v49, %v618_v37  ;;  %v675_v60 = vadd.f32 %v671_v54, %v541_v56  ;;  %v673_v3 = vmul.f32 %v1576_v52, %v1576_v52  ;;  %v705_v52 = vld [vmem:[#allocation7 + $0x40] sm:$0xff] }
  0xc6   : > { %v658_v61 = vsel %vm386_vm6, %v654_v9, %v626_v39  ;;  %v543_v0 = vadd.f32 %v539_v36, %v405_v17  ;;  %v406_v4 = vmul.f32 %v273_v2, %v273_v2  ;;  %v676_v11 = vadd.f32 %v672_v58, %v542_v62  ;;  %v706_v2 = vld [vmem:[#allocation7 + $0x48] sm:$0xff] }
  0xc7   : > { %v662_v26 = vmul.f32 %v658_v61, %v548_v6  ;;  %v696_v10 = vadd.f32 %v692_v7, %v675_v60  ;;  %v540_v12 = vmul.f32 %v414_v34, %v414_v34  ;;  %v674_v15 = vmul.f32 %v548_v6, %v548_v6 }
  0xc8   : > { %v677_v14 = vadd.f32 %v673_v3, %v543_v0  ;;  %v533_v20 = vadd.f32 %v1423_v57, %v1397_v40  ;;  %v534_v16 = vadd.f32 %v1494_v5, %v1474_v50  ;;  %v697_v21 = vadd.f32 %v693_v63, %v676_v11 }
  0xc9   : > { %v666_v19 = vadd.f32 %v662_v26, %v532_v8  ;;  %700 = vst [vmem:[#allocation7 + $0x20] sm:$0xff] %v696_v10  ;;  %v544_v22 = vadd.f32 %v540_v12, %v406_v4  ;;  %v535_v23 = vadd.f32 %v1561_v29, %v1540_v1  ;;  %v536_v40 = vadd.f32 %v524_v44, %v1602_v18 }
  0xca   : > { %v698_v24 = vadd.f32 %v694_v53, %v677_v14  ;;  %v667_v25 = vadd.f32 %v1456_v30, %v533_v20  ;;  %v668_v27 = vadd.f32 %v1519_v38, %v534_v16  ;;  %701 = vst [vmem:[#allocation7 + $0x28] sm:$0xff] %v697_v21 }
  0xcb   : > { %v686_v57 = vadd.f32 %v682_v13, %v666_v19  ;;  %v678_v50 = vadd.f32 %v674_v15, %v544_v22  ;;  %v669_v5 = vadd.f32 %v1586_v59, %v535_v23  ;;  %v670_v37 = vadd.f32 %v658_v61, %v536_v40 }
  0xcc   : > { %702 = vst [vmem:[#allocation7 + $0x30] sm:$0xff] %v698_v24  ;;  %v709_v34 = vadd.f32 %v705_v52, %v667_v25  ;;  %v710_v35 = vadd.f32 %v706_v2, %v668_v27 }
  0xcd   : > { %690 = vst [vmem:[#allocation7 + $0x18] sm:$0xff] %v686_v57  ;;  %v699_v1 = vadd.f32 %v695_v28, %v678_v50  ;;  %v711_v29 = vadd.f32 %v707_v32, %v669_v5  ;;  %v712_v30 = vadd.f32 %v708_v33, %v670_v37 }
  0xce   : > { %713 = vst [vmem:[#allocation7 + $0x40] sm:$0xff] %v709_v34 }
  0xcf   : > { %703 = vst [vmem:[#allocation7 + $0x38] sm:$0xff] %v699_v1 }
  0xd0   : > { %714 = vst [vmem:[#allocation7 + $0x48] sm:$0xff] %v710_v35 }
  0xd1   : > { %715 = vst [vmem:[#allocation7 + $0x50] sm:$0xff] %v711_v29 }
  0xd2   : > { %716 = vst [vmem:[#allocation7 + $0x58] sm:$0xff] %v712_v30 }
  0xd3 PF: > { %p943_p7 = scmp.ne.s32.totalorder %s1176_s12, 2 }
  0xd5   : > { %719 = sbr.rel (%p943_p7) target bundleno = 239 (0xef), region = 48 }
  0xda   : > { %v720_v38 = vld [vmem:[%s1337_s4] sm:$0xff]  ;;  %vm721_vm0 = vcmask 785408   ;;  %vm755_vm1 = vcmask 1040384   ;;  %v1190_v41 = vmov 0.0   ;;  %vm757_vm6 = vcmask 1041408   ;;  %v788_v45 = vld [vmem:[#allocation7 + $0x20] sm:$0xff] }
  0xdb   : > { %v723_v59 = vld [vmem:[%s1343_s18] sm:$0x3]  ;;  %v722_v39 = vsel %vm721_vm0, %v720_v38, 0.0  ;;  %vm759_vm10 = vcmask 1042432   ;;  %vm761_vm11 = vcmask 1043456   ;;  %vm763_vm12 = vcmask 1044480  }
  0xdc   : > { %v724_v18 = vcvt.s32.f32 %v723_v59  ;;  %v773_v55 = vmul.f32 %v722_v39, %v722_v39  ;;  %vm765_vm13 = vcmask 1045504   ;;  %vm767_vm14 = vcmask 1046528   ;;  %v801_v60 = vld [vmem:[#allocation7 + $0x40] sm:$0xff] }
  0xdd   : > { %v775_v63 = vld [vmem:[#allocation7] sm:$0xff] }
  0xde   : > { %vm725_vm2 = vcmp.eq.f32.partialorder %v724_v18, 0.0  ;;  %vm728_vm3 = vcmp.eq.f32.partialorder %v724_v18, 1.0  ;;  %vm731_vm4 = vcmp.eq.f32.partialorder %v724_v18, 2.0  ;;  %vm734_vm5 = vcmp.eq.f32.partialorder %v724_v18, 3.0 }
  0xdf   : > { %v944_v42 = vsel %vm725_vm2, 1.0, %v1190_v41  ;;  %v945_v43 = vsel %vm728_vm3, 1.0, %v1190_v41  ;;  %v946_v47 = vsel %vm731_vm4, 1.0, %v1190_v41  ;;  %v947_v48 = vsel %vm734_vm5, 1.0, %v1190_v41 }
  0xe0   : > { %v738_v44 = vperm.slane %v945_v43, 0  ;;  %v741_v51 = vperm.slane %v946_v47, 0  ;;  %v744_v54 = vperm.slane %v947_v48, 0  ;;  %v747_v46 = vperm.slane %v944_v42, 1 }
  0xe1   : > { %v749_v56 = vperm.slane %v945_v43, 1  ;;  %v751_v6 = vperm.slane %v946_v47, 1  ;;  %v792_v7 = vadd.f32 %v788_v45, %v773_v55  ;;  %v753_v58 = vperm.slane %v947_v48, 1 }
  0xe2   : > { %v756_v31 = vsel %vm755_vm1, %v944_v42, %v738_v44 }
  0xe3   : > { %v758_v49 = vsel %vm757_vm6, %v756_v31, %v741_v51  ;;  %796 = vst [vmem:[#allocation7 + $0x20] sm:$0xff] %v792_v7 }
  0xe4   : > { %v760_v17 = vsel %vm759_vm10, %v758_v49, %v744_v54 }
  0xe5   : > { %v762_v36 = vsel %vm761_vm11, %v760_v17, %v747_v46 }
  0xe6   : > { %v764_v8 = vsel %vm763_vm12, %v762_v36, %v749_v56 }
  0xe7   : > { %v766_v9 = vsel %vm765_vm13, %v764_v8, %v751_v6 }
  0xe8   : > { %v768_v62 = vsel %vm767_vm14, %v766_v9, %v753_v58 }
  0xe9   : > { %v769_v61 = vsel %vm721_vm0, %v768_v62, 0.0 }
  0xea   : > { %v770_v0 = vmul.f32 %v769_v61, %v722_v39  ;;  %v805_v3 = vadd.f32 %v801_v60, %v769_v61 }
  0xec   : > { %v779_v4 = vadd.f32 %v775_v63, %v770_v0  ;;  %809 = vst [vmem:[#allocation7 + $0x40] sm:$0xff] %v805_v3 }
  0xee   : > { %783 = vst [vmem:[#allocation7] sm:$0xff] %v779_v4 }
  0xef PF: > { %p964_p12 = scmp.eq.s32.totalorder %s915_s15, 2  ;;  %s823_s5 = sshll.u32 %s1686_s2, 4  ;;  %s824_s5 = int_to_ptr.hbm [resolvable:$true] %s823_s5 }
  0xf0   : > { %s1191_s6 = smov [#allocation7]   ;;  %s1192_s7 = smov 512  }
  0xf1   : > { %s821_s30 = sshll.u32 %s1191_s6, 4  ;;  %s1193_s8 = smov 32   ;;  %s822_s30 = int_to_ptr.vmem [resolvable:$true] %s821_s30 }
  0xf2   : > { %961 = dma.vmem_to_hbm [thread:$0]  (%p964_p12), %s822_s30, 1536, %s824_s5, [#allocation4], %s1192_s7, %s1192_s7, %s1193_s8  }
  0xf3   : > { %1159 = dma.done.wait (%p964_p12), [#allocation4], 1536  }
  0xf4   : > { %1161 = vsyncadd (%p964_p12), [#allocation4], 4294965760 }
  0xf5 PF: > { %s19_s14 = sadd.s32 1, %s1184_s14   ;;  %s1691_s9 = smov %s1168_s10 }
  0xf6   : > { %p16_p13 = scmp.ge.s32.totalorder %s19_s14, 5   ;;  %s1692_s10 = smov %s1172_s11 }
  0xf7   : > { %s1693_s11 = smov %s1259_s21  ;;  %s1694_s12 = smov %s1180_s13 }
  0xf8   : > { %s1695_s13 = smov %s1697_s16  ;;  %18 = sbr.rel (!%p16_p13) target bundleno = 7 (0x7), region = 95 }
  0xfd   :  { %840 = vsyncpa [#allocation3], 1 }
  0xfe   :  { %842 = vsyncpa [#allocation3 + $0x1], 1 }
  0xff   :  { %843 = vsyncpa [#allocation6], 1 }
 0x100   :  { %845 = vsyncpa [#allocation6 + $0x1], 1 }
 0x101   :  { %846 = vsyncpa [#allocation4], 1 }
 0x102   :  { %848 = vsyncpa [#allocation4 + $0x1], 1 }

</bundles_post_ra>
